<compile_context>
chip_gen: v7x
topology: tpu7x:2x2x1
jax: 0.10.0
libtpu: 0.0.40
codegen_flags: <defaults>
</compile_context>

<pallas_src>
import jax
import jax.numpy as jnp
from jax.experimental import pallas as pl
from jax.experimental.pallas import tpu as pltpu


def _round_up(n: int, m: int) -> int:
    return ((n + m - 1) // m) * m


def _choose_tile_m(batch: int) -> int:
    """Pick a batch tile that minimises padding waste; prefer bigger tiles and
    >= 2 grid steps (so v7x's second TensorCore gets work) on ties."""
    if batch <= 256:
        return _round_up(batch, 8)
    best = None
    for t in (1024, 512, 256, 128):
        padded = _round_up(batch, t)
        n_tiles = padded // t
        waste = padded - batch
        key = (waste, 0 if n_tiles >= 2 else 1, -t)
        if best is None or key < best[0]:
            best = (key, t)
    return best[1]


def ae_kernel(x_ref, w1_ref, w6_ref, wsmall_ref, bmid_ref, b6_ref, out_ref):
    """One batch tile of the fused 5-matmul AE forward pass.

    x_ref      : (TILE_M, D0)  bf16  zero-padded input activations
    w1_ref     : (D0, DH)      bf16  encoder layer-1 weight (padded)
    w6_ref     : (DH, D0)      bf16  decoder layer-3 weight (padded)
    wsmall_ref : (3, DH, DH)   bf16  packed [w2, w3@w4 (fused), w5] (padded)
    bmid_ref   : (8, DH)       f32   rows 0..3 = b1, b2, b34, b5 (padded)
    b6_ref     : (1, D0)       f32   decoder output bias (padded)
    out_ref    : (TILE_M, D0)  f32
    """
    # ---- encoder layer 1 (big): bf16 operands straight from HBM, f32 acc.
    h = jnp.dot(x_ref[...], w1_ref[...], preferred_element_type=jnp.float32)
    h = jnp.maximum(h + bmid_ref[0:1, :], 0.0)

    # ---- tiny middle layers: bf16 operands, f32 accumulate, f32 bias/ReLU.
    h = jnp.dot(h.astype(jnp.bfloat16), wsmall_ref[0],
                preferred_element_type=jnp.float32)
    h = jnp.maximum(h + bmid_ref[1:2, :], 0.0)

    h = jnp.dot(h.astype(jnp.bfloat16), wsmall_ref[1],   # fused w3@w4, no ReLU between
                preferred_element_type=jnp.float32)
    h = jnp.maximum(h + bmid_ref[2:3, :], 0.0)

    h = jnp.dot(h.astype(jnp.bfloat16), wsmall_ref[2],
                preferred_element_type=jnp.float32)
    h = jnp.maximum(h + bmid_ref[3:4, :], 0.0)

    # ---- decoder layer 3 (big): bf16 operands, f32 accumulate, f32 bias.
    out = jnp.dot(h.astype(jnp.bfloat16), w6_ref[...],
                  preferred_element_type=jnp.float32)
    out_ref[...] = out + b6_ref[...]


def ae_forward(x, packed):
    """Run the packed AE forward pass. x: (batch, input_size)."""
    w1_p, w6_p, w_small, bmid, b6_p = packed
    batch, d_in = x.shape
    D0, DH = w1_p.shape

    tile_m = _choose_tile_m(batch)
    padded_batch = _round_up(batch, tile_m)

    # Pad + bf16-cast in one shot (single fused XLA op, halves x DMA bytes).
    x_p = jnp.pad(x.astype(jnp.bfloat16),
                  ((0, padded_batch - batch), (0, D0 - d_in)))

    grid = (padded_batch // tile_m,)

    flops = 2 * padded_batch * (D0 * DH + 3 * DH * DH + DH * D0)
    bytes_accessed = (x_p.size * 2 + w1_p.size * 2 + w6_p.size * 2
                      + w_small.size * 2 + bmid.size * 4 + b6_p.size * 4
                      + padded_batch * D0 * 4)

    # VMEM budget: double-buffered x (bf16) + out (f32) tiles, single-buffered
    # resident weights/biases, plus f32 activation temporaries.
    vmem_need = (2 * tile_m * D0 * (2 + 4)
                 + 2 * D0 * DH * 2
                 + 3 * DH * DH * 2
                 + (8 * DH + D0) * 4
                 + 6 * tile_m * DH * 4)
    vmem_limit = min(60 << 20, max(32 << 20, _round_up(int(vmem_need * 1.7), 1 << 20)))

    resident = dict(pipeline_mode=pl.Buffered(1))  # blocks never change -> 1 buffer

    out = pl.pallas_call(
        ae_kernel,
        out_shape=jax.ShapeDtypeStruct((padded_batch, D0), jnp.float32),
        grid_spec=pltpu.PrefetchScalarGridSpec(
            num_scalar_prefetch=0,
            grid=grid,
            in_specs=[
                pl.BlockSpec((tile_m, D0), lambda i: (i, 0)),              # x tile (bf16)
                pl.BlockSpec((D0, DH), lambda i: (0, 0), **resident),      # w1
                pl.BlockSpec((DH, D0), lambda i: (0, 0), **resident),      # w6
                pl.BlockSpec((3, DH, DH), lambda i: (0, 0, 0), **resident),  # packed small w
                pl.BlockSpec((8, DH), lambda i: (0, 0), **resident),       # mid biases
                pl.BlockSpec((1, D0), lambda i: (0, 0), **resident),       # b6
            ],
            out_specs=pl.BlockSpec((tile_m, D0), lambda i: (i, 0)),
        ),
        compiler_params=pltpu.CompilerParams(
            dimension_semantics=("parallel",),
            vmem_limit_bytes=vmem_limit),
        cost_estimate=pl.CostEstimate(
            flops=flops, transcendentals=0, bytes_accessed=bytes_accessed),
    )(x_p, w1_p, w6_p, w_small, bmid, b6_p)

    # NOTE: padded rows carry bias-propagated garbage; always slice before use.
    return out[:batch, :d_in]


ae_forward = jax.jit(ae_forward)


def init_linear(key, fan_in, fan_out):
    """nn.Linear-style uniform(-1/sqrt(in), 1/sqrt(in)) init."""
    kw, kb = jax.random.split(key)
    bound = 1.0 / (fan_in ** 0.5)
    w = jax.random.uniform(kw, (fan_in, fan_out), jnp.float32, -bound, bound)
    # Snap weights to bf16-representable values so bf16 storage in the kernel
    # is exact (the DMA-byte win comes for free, no quantization gap).
    w = w.astype(jnp.bfloat16).astype(jnp.float32)
    b = jax.random.uniform(kb, (1, fan_out), jnp.float32, -bound, bound)
    return w, b


def build_ae_params(key, input_size):
    sf = [0.1, 0.01, 0.001]
    d0 = input_size
    d1 = int(input_size * sf[0])
    d2 = int(input_size * sf[1])
    d3 = int(input_size * sf[2])
    dims = [(d0, d1), (d1, d2), (d2, d3),   # encoder
            (d3, d2), (d2, d1), (d1, d0)]   # decoder
    keys = jax.random.split(key, len(dims))
    return [init_linear(k, fi, fo) for k, (fi, fo) in zip(keys, dims)]


def pack_params(params):
    """Pad/fuse/quantize the 6-layer params into 5 kernel inputs."""
    (w1, b1), (w2, b2), (w3, b3), (w4, b4), (w5, b5), (w6, b6) = params
    d0, d1 = w1.shape
    d2 = w2.shape[1]
    D0 = _round_up(d0, 128)
    DH = _round_up(max(d1, d2), 128)

    # Fuse the ReLU-free pair (encoder L3 + decoder L1):
    #   (h @ w3 + b3) @ w4 + b4  ==  h @ (w3 @ w4) + (b3 @ w4 + b4)
    hi = jax.lax.Precision.HIGHEST
    w34 = jnp.dot(w3, w4, precision=hi)
    b34 = jnp.dot(b3, w4, precision=hi) + b4

    def pad2(a, rows, cols):
        return jnp.zeros((rows, cols), jnp.float32).at[:a.shape[0], :a.shape[1]].set(a)

    w1_p = pad2(w1, D0, DH).astype(jnp.bfloat16)
    w6_p = pad2(w6, DH, D0).astype(jnp.bfloat16)
    w_small = jnp.stack([pad2(w2, DH, DH),
                         pad2(w34, DH, DH),
                         pad2(w5, DH, DH)]).astype(jnp.bfloat16)

    bmid = jnp.zeros((8, DH), jnp.float32)
    bmid = bmid.at[0, :d1].set(b1[0])
    bmid = bmid.at[1, :d2].set(b2[0])
    bmid = bmid.at[2, :d2].set(b34[0])
    bmid = bmid.at[3, :d1].set(b5[0])

    b6_p = jnp.zeros((1, D0), jnp.float32).at[0, :d0].set(b6[0])
    return w1_p, w6_p, w_small, bmid, b6_p


def ae_reference(x, params):
    """Pure-JAX f32 reference matching the PyTorch module semantics."""
    h = x.astype(jnp.float32)
    relu_after = [True, True, False, True, True, False]
    for (w, b), do_relu in zip(params, relu_after):
        h = jnp.dot(h, w, precision=jax.lax.Precision.HIGHEST) + b
        if do_relu:
            h = jnp.maximum(h, 0.0)
    return h


if __name__ == "__main__":
    input_size = 1000  # smallest size for which int(input_size * 0.001) >= 1
    batch = 8

    key = jax.random.PRNGKey(0)
    kx, kp = jax.random.split(key)
    x = jax.random.normal(kx, (batch, input_size), jnp.float32)
    params = build_ae_params(kp, input_size)
    packed = pack_params(params)

    out = jax.block_until_ready(ae_forward(x, packed))

    ref = ae_reference(x, params)
    assert out.shape == (batch, input_size)
    assert jnp.allclose(out, ref, atol=2e-2, rtol=2e-2), (
        f"mismatch vs reference: max abs diff = {jnp.max(jnp.abs(out - ref))}")

    print("KERNEL_OK")
</pallas_src>

<mosaic_0001>
module attributes {stable_mosaic.version = 11 : i64} {
  func.func @ae_kernel(%arg0: i32, %arg1: memref<8x1024xbf16, #tpu.memory_space<vmem>>, %arg2: memref<1024x128xbf16, #tpu.memory_space<vmem>>, %arg3: memref<128x1024xbf16, #tpu.memory_space<vmem>>, %arg4: memref<3x128x128xbf16, #tpu.memory_space<vmem>>, %arg5: memref<8x128xf32, #tpu.memory_space<vmem>>, %arg6: memref<1x1024xf32, #tpu.memory_space<vmem>>, %arg7: memref<8x1024xf32, #tpu.memory_space<vmem>>) attributes {dimension_semantics = [#tpu.dimension_semantics<parallel>], iteration_bounds = array<i64: 1>, scalar_prefetch = 0 : i64, scratch_operands = 0 : i64, tpu.core_type = #tpu.core_type<tc>, window_params = [{transform_indices = @transform_0, window_bounds = array<i64: 8, 1024>}, {pipeline_mode = #tpu.pipeline_mode<synchronous>, transform_indices = @transform_1, window_bounds = array<i64: 1024, 128>}, {pipeline_mode = #tpu.pipeline_mode<synchronous>, transform_indices = @transform_2, window_bounds = array<i64: 128, 1024>}, {pipeline_mode = #tpu.pipeline_mode<synchronous>, transform_indices = @transform_3, window_bounds = array<i64: 3, 128, 128>}, {pipeline_mode = #tpu.pipeline_mode<synchronous>, transform_indices = @transform_4, window_bounds = array<i64: 8, 128>}, {pipeline_mode = #tpu.pipeline_mode<synchronous>, transform_indices = @transform_5, window_bounds = array<i64: 1, 1024>}, {transform_indices = @transform_6, window_bounds = array<i64: 8, 1024>}]} {
    %c0 = arith.constant 0 : index
    %c0_0 = arith.constant 0 : index
    %0 = vector.load %arg1[%c0, %c0_0] : memref<8x1024xbf16, #tpu.memory_space<vmem>>, vector<8x1024xbf16>
    %c0_1 = arith.constant 0 : index
    %c0_2 = arith.constant 0 : index
    %1 = vector.load %arg2[%c0_1, %c0_2] : memref<1024x128xbf16, #tpu.memory_space<vmem>>, vector<1024x128xbf16>
    %cst = arith.constant dense<0.000000e+00> : vector<8x128xf32>
    %2 = tpu.matmul %0, %1, %cst {dimension_numbers = #tpu.dot_dimension_numbers<[1], [0], [0], [1], [0, 0, 1, 1], [], []>} : vector<8x1024xbf16>, vector<1024x128xbf16>, vector<8x128xf32> -> vector<8x128xf32>
    %c0_3 = arith.constant 0 : index
    %c0_4 = arith.constant 0 : index
    %3 = vector.load %arg5[%c0_3, %c0_4] : memref<8x128xf32, #tpu.memory_space<vmem>>, vector<1x128xf32>
    %4 = vector.broadcast %3 : vector<1x128xf32> to vector<8x128xf32>
    %5 = arith.addf %2, %4 : vector<8x128xf32>
    %cst_5 = arith.constant 0.000000e+00 : f32
    %6 = vector.broadcast %cst_5 : f32 to vector<8x128xf32>
    %7 = arith.maximumf %5, %6 : vector<8x128xf32>
    %8 = arith.truncf %7 : vector<8x128xf32> to vector<8x128xbf16>
    %c0_6 = arith.constant 0 : index
    %c0_7 = arith.constant 0 : index
    %c0_8 = arith.constant 0 : index
    %9 = vector.load %arg4[%c0_6, %c0_7, %c0_8] : memref<3x128x128xbf16, #tpu.memory_space<vmem>>, vector<1x128x128xbf16>
    %10 = vector.shape_cast %9 : vector<1x128x128xbf16> to vector<128x128xbf16>
    %cst_9 = arith.constant dense<0.000000e+00> : vector<8x128xf32>
    %11 = tpu.matmul %8, %10, %cst_9 {dimension_numbers = #tpu.dot_dimension_numbers<[1], [0], [0], [1], [0, 0, 1, 1], [], []>} : vector<8x128xbf16>, vector<128x128xbf16>, vector<8x128xf32> -> vector<8x128xf32>
    %c1 = arith.constant 1 : index
    %c0_10 = arith.constant 0 : index
    %12 = vector.load %arg5[%c1, %c0_10] : memref<8x128xf32, #tpu.memory_space<vmem>>, vector<1x128xf32>
    %13 = vector.broadcast %12 : vector<1x128xf32> to vector<8x128xf32>
    %14 = arith.addf %11, %13 : vector<8x128xf32>
    %cst_11 = arith.constant 0.000000e+00 : f32
    %15 = vector.broadcast %cst_11 : f32 to vector<8x128xf32>
    %16 = arith.maximumf %14, %15 : vector<8x128xf32>
    %17 = arith.truncf %16 : vector<8x128xf32> to vector<8x128xbf16>
    %c1_12 = arith.constant 1 : index
    %c0_13 = arith.constant 0 : index
    %c0_14 = arith.constant 0 : index
    %18 = vector.load %arg4[%c1_12, %c0_13, %c0_14] : memref<3x128x128xbf16, #tpu.memory_space<vmem>>, vector<1x128x128xbf16>
    %19 = vector.shape_cast %18 : vector<1x128x128xbf16> to vector<128x128xbf16>
    %cst_15 = arith.constant dense<0.000000e+00> : vector<8x128xf32>
    %20 = tpu.matmul %17, %19, %cst_15 {dimension_numbers = #tpu.dot_dimension_numbers<[1], [0], [0], [1], [0, 0, 1, 1], [], []>} : vector<8x128xbf16>, vector<128x128xbf16>, vector<8x128xf32> -> vector<8x128xf32>
    %c2 = arith.constant 2 : index
    %c0_16 = arith.constant 0 : index
    %21 = vector.load %arg5[%c2, %c0_16] : memref<8x128xf32, #tpu.memory_space<vmem>>, vector<1x128xf32>
    %22 = vector.broadcast %21 : vector<1x128xf32> to vector<8x128xf32>
    %23 = arith.addf %20, %22 : vector<8x128xf32>
    %cst_17 = arith.constant 0.000000e+00 : f32
    %24 = vector.broadcast %cst_17 : f32 to vector<8x128xf32>
    %25 = arith.maximumf %23, %24 : vector<8x128xf32>
    %26 = arith.truncf %25 : vector<8x128xf32> to vector<8x128xbf16>
    %c2_18 = arith.constant 2 : index
    %c0_19 = arith.constant 0 : index
    %c0_20 = arith.constant 0 : index
    %27 = vector.load %arg4[%c2_18, %c0_19, %c0_20] : memref<3x128x128xbf16, #tpu.memory_space<vmem>>, vector<1x128x128xbf16>
    %28 = vector.shape_cast %27 : vector<1x128x128xbf16> to vector<128x128xbf16>
    %cst_21 = arith.constant dense<0.000000e+00> : vector<8x128xf32>
    %29 = tpu.matmul %26, %28, %cst_21 {dimension_numbers = #tpu.dot_dimension_numbers<[1], [0], [0], [1], [0, 0, 1, 1], [], []>} : vector<8x128xbf16>, vector<128x128xbf16>, vector<8x128xf32> -> vector<8x128xf32>
    %c3 = arith.constant 3 : index
    %c0_22 = arith.constant 0 : index
    %30 = vector.load %arg5[%c3, %c0_22] : memref<8x128xf32, #tpu.memory_space<vmem>>, vector<1x128xf32>
    %31 = vector.broadcast %30 : vector<1x128xf32> to vector<8x128xf32>
    %32 = arith.addf %29, %31 : vector<8x128xf32>
    %cst_23 = arith.constant 0.000000e+00 : f32
    %33 = vector.broadcast %cst_23 : f32 to vector<8x128xf32>
    %34 = arith.maximumf %32, %33 : vector<8x128xf32>
    %35 = arith.truncf %34 : vector<8x128xf32> to vector<8x128xbf16>
    %c0_24 = arith.constant 0 : index
    %c0_25 = arith.constant 0 : index
    %36 = vector.load %arg3[%c0_24, %c0_25] : memref<128x1024xbf16, #tpu.memory_space<vmem>>, vector<128x1024xbf16>
    %cst_26 = arith.constant dense<0.000000e+00> : vector<8x1024xf32>
    %37 = tpu.matmul %35, %36, %cst_26 {dimension_numbers = #tpu.dot_dimension_numbers<[1], [0], [0], [1], [0, 0, 1, 1], [], []>} : vector<8x128xbf16>, vector<128x1024xbf16>, vector<8x1024xf32> -> vector<8x1024xf32>
    %c0_27 = arith.constant 0 : index
    %c0_28 = arith.constant 0 : index
    %38 = vector.load %arg6[%c0_27, %c0_28] : memref<1x1024xf32, #tpu.memory_space<vmem>>, vector<1x1024xf32>
    %39 = vector.broadcast %38 : vector<1x1024xf32> to vector<8x1024xf32>
    %40 = arith.addf %37, %39 : vector<8x1024xf32>
    %c0_29 = arith.constant 0 : index
    %c0_30 = arith.constant 0 : index
    %41 = vector.load %arg7[%c0_29, %c0_30] : memref<8x1024xf32, #tpu.memory_space<vmem>>, vector<8x1024xf32>
    tpu.vector_store %arg7[%c0_29, %c0_30], %40 {strides = array<i32>} : memref<8x1024xf32, #tpu.memory_space<vmem>>, vector<8x1024xf32>,
    return
  }
  func.func @transform_0(%arg0: i32) -> (i32, i32) {
    %c0_i32 = arith.constant 0 : i32
    %c0_i32_0 = arith.constant 0 : i32
    return %arg0, %c0_i32 : i32, i32
  }
  func.func @transform_1(%arg0: i32) -> (i32, i32) {
    %c0_i32 = arith.constant 0 : i32
    %c0_i32_0 = arith.constant 0 : i32
    %c0_i32_1 = arith.constant 0 : i32
    return %c0_i32, %c0_i32_0 : i32, i32
  }
  func.func @transform_2(%arg0: i32) -> (i32, i32) {
    %c0_i32 = arith.constant 0 : i32
    %c0_i32_0 = arith.constant 0 : i32
    %c0_i32_1 = arith.constant 0 : i32
    return %c0_i32, %c0_i32_0 : i32, i32
  }
  func.func @transform_3(%arg0: i32) -> (i32, i32, i32) {
    %c0_i32 = arith.constant 0 : i32
    %c0_i32_0 = arith.constant 0 : i32
    %c0_i32_1 = arith.constant 0 : i32
    %c0_i32_2 = arith.constant 0 : i32
    return %c0_i32, %c0_i32_0, %c0_i32_1 : i32, i32, i32
  }
  func.func @transform_4(%arg0: i32) -> (i32, i32) {
    %c0_i32 = arith.constant 0 : i32
    %c0_i32_0 = arith.constant 0 : i32
    %c0_i32_1 = arith.constant 0 : i32
    return %c0_i32, %c0_i32_0 : i32, i32
  }
  func.func @transform_5(%arg0: i32) -> (i32, i32) {
    %c0_i32 = arith.constant 0 : i32
    %c0_i32_0 = arith.constant 0 : i32
    %c0_i32_1 = arith.constant 0 : i32
    return %c0_i32, %c0_i32_0 : i32, i32
  }
  func.func @transform_6(%arg0: i32) -> (i32, i32) {
    %c0_i32 = arith.constant 0 : i32
    %c0_i32_0 = arith.constant 0 : i32
    return %arg0, %c0_i32 : i32, i32
  }
}

</mosaic_0001>

<bundles_post_ra>
// kernel: ae_forward.1
= control target key start
LH: loop header
LB: loop body
LE: loop exit
PB: predicated region body
PF: predicated region fallthrough
CT: control target
= control target key end

     0   :  { %11 = vsyncpa [#allocation3], 0  ;;  %s2423_s0 = inlined_call_operand.vmem [shape: bf16[8,1024], index: 0, kind: input, shape index: {}]   ;;  %s2424_s1 = inlined_call_operand.hbm [shape: bf16[1024,128], index: 1, kind: input, shape index: {}]   ;;  %s2425_s2 = inlined_call_operand.hbm [shape: bf16[128,1024], index: 2, kind: input, shape index: {}]   ;;  %s2426_s3 = inlined_call_operand.hbm [shape: bf16[3,128,128], index: 3, kind: input, shape index: {}]   ;;  %s2427_s4 = inlined_call_operand.vmem [shape: f32[8,128], index: 4, kind: input, shape index: {}]   ;;  %s2428_s5 = inlined_call_operand.vmem [shape: f32[1,1024], index: 5, kind: input, shape index: {}]   ;;  %s2429_s6 = inlined_call_operand.hbm [shape: f32[8,1024], index: 6, kind: output, shape index: {}]  }
   0x1   :  { %12 = vsyncpa [#allocation6], 0 }
   0x2   :  { %13 = vsyncpa [#allocation4], 0  ;;  %s2266_s21 = smov [#allocation5]   ;;  %s2172_s25 = scalar_lea.hbm %s2425_s2, 8192 }
   0x3   :  { %s33_s22 = sshll.u32 %s2266_s21, 4  ;;  %p2173_p0 = scmp.ne.s32.totalorder %s2425_s2, %s2172_s25  ;;  %s34_s22 = int_to_ptr.vmem [resolvable:$true] %s33_s22 }
   0x4   :  { %p2176_p1 = scmp.lt.u32.totalorder %s2172_s25, %s2425_s2 }
   0x6   :  { %p2178_p2 = pnand %p2176_p1, %p2173_p0 }
   0x8   :  { %2181 = shalt.err (!%p2178_p2)
}
   0x9   :  { %s2182_s30 = scalar_lea.vmem %s34_s22, 8192  ;;  %p2187_p4 = scmp.lt.s32.totalorder %s34_s22, %s34_s22 }
   0xa   :  { %p2183_p3 = scmp.ne.s32.totalorder %s34_s22, %s2182_s30  ;;  %p2188_p5 = scmp.lt.s32.totalorder %s2182_s30, %s2182_s30 }
   0xc   :  { %p2189_p6 = por %p2188_p5, %p2187_p4 }
   0xe   :  { %p2190_p7 = pnand %p2189_p6, %p2183_p3 }
  0x10   :  { %2193 = shalt.err (!%p2190_p7)
}
  0x11   :  { %s2267_s7 = smov 512   ;;  %s2268_s8 = smov 32  }
  0x12   :  { %39 = dma.hbm_to_vmem [thread:$0]  %s2425_s2, 8192, %s34_s22, [#allocation6], %s2267_s7, %s2267_s7, %s2268_s8  }
  0x13   :  { %s2269_s11 = smov [#allocation2]   ;;  %s2194_s15 = scalar_lea.hbm %s2424_s1, 8192 }
  0x14   :  { %s21_s12 = sshll.u32 %s2269_s11, 4  ;;  %p2195_p8 = scmp.ne.s32.totalorder %s2424_s1, %s2194_s15  ;;  %s22_s12 = int_to_ptr.vmem [resolvable:$true] %s21_s12 }
  0x15   :  { %p2198_p9 = scmp.lt.u32.totalorder %s2194_s15, %s2424_s1 }
  0x17   :  { %p2200_p10 = pnand %p2198_p9, %p2195_p8 }
  0x19   :  { %2203 = shalt.err (!%p2200_p10)
}
  0x1a   :  { %s2204_s20 = scalar_lea.vmem %s22_s12, 8192  ;;  %p2209_p12 = scmp.lt.s32.totalorder %s22_s12, %s22_s12 }
  0x1b   :  { %p2205_p11 = scmp.ne.s32.totalorder %s22_s12, %s2204_s20  ;;  %p2210_p13 = scmp.lt.s32.totalorder %s2204_s20, %s2204_s20 }
  0x1d   :  { %p2211_p0 = por %p2210_p13, %p2209_p12 }
  0x1f   :  { %p2212_p1 = pnand %p2211_p0, %p2205_p11 }
  0x21   :  { %2215 = shalt.err (!%p2212_p1)
}
  0x22   :  { %s2270_s2 = smov 64   ;;  %s2271_s21 = smov 4  }
  0x23   :  { %27 = dma.hbm_to_vmem [thread:$0]  %s2424_s1, 8192, %s22_s12, [#allocation3], %s2270_s2, %s2270_s2, %s2271_s21  }
  0x24   :  { %s2272_s24 = smov [#allocation7]   ;;  %s2216_s28 = scalar_lea.hbm %s2426_s3, 3072 }
  0x25   :  { %s45_s25 = sshll.u32 %s2272_s24, 4  ;;  %p2217_p2 = scmp.ne.s32.totalorder %s2426_s3, %s2216_s28  ;;  %s46_s25 = int_to_ptr.vmem [resolvable:$true] %s45_s25 }
  0x26   :  { %p2220_p3 = scmp.lt.u32.totalorder %s2216_s28, %s2426_s3 }
  0x28   :  { %p2222_p4 = pnand %p2220_p3, %p2217_p2 }
  0x2a   :  { %2225 = shalt.err (!%p2222_p4)
}
  0x2b   :  { %s2226_s9 = scalar_lea.vmem %s46_s25, 3072  ;;  %p2231_p6 = scmp.lt.s32.totalorder %s46_s25, %s46_s25 }
  0x2c   :  { %p2227_p5 = scmp.ne.s32.totalorder %s46_s25, %s2226_s9  ;;  %p2232_p7 = scmp.lt.s32.totalorder %s2226_s9, %s2226_s9 }
  0x2e   :  { %p2233_p8 = por %p2232_p7, %p2231_p6 }
  0x30   :  { %p2234_p9 = pnand %p2233_p8, %p2227_p5 }
  0x32   :  { %2237 = shalt.err (!%p2234_p9)
}
  0x33   :  { %51 = dma.hbm_to_vmem [thread:$0]  %s2426_s3, 3072, %s46_s25, [#allocation6], %s2270_s2, %s2270_s2, %s2271_s21  }
  0x34   :  { %2260 = dma.done.wait [#allocation3], 8192  }
  0x35   :  { %2261 = vsyncadd [#allocation3], 4294959104 }
  0x36   :  { %2262 = dma.done.wait [#allocation6], 11264  }
  0x37   :  { %2263 = vsyncadd [#allocation6], 4294956032  ;;  %v2076_v0 = vld [vmem:[#allocation2 + $0x40] sm:$0xff]   ;;  %v2080_v4 = vld [vmem:[#allocation2 + $0x48] sm:$0xff]   ;;  %vm2274_vm0 = vmmov 0  }
  0x38   :  { %v2077_v1 = vld [vmem:[#allocation2 + $0xc0] sm:$0xff]   ;;  %1890 = vmatprep.subr.bf16.mxu0 %v2076_v0  ;;  %v2081_v5 = vld [vmem:[#allocation2 + $0xc8] sm:$0xff]   ;;  %v2084_v8 = vld [vmem:[#allocation2 + $0x50] sm:$0xff]  }
  0x39   :  { %v2078_v2 = vld [vmem:[#allocation2] sm:$0xff]   ;;  %1912 = vmatprep.subr.bf16.mxu1 %v2077_v1  ;;  %v2082_v6 = vld [vmem:[#allocation2 + $0x8] sm:$0xff]   ;;  %v2085_v9 = vld [vmem:[#allocation2 + $0xd0] sm:$0xff]  }
  0x3a   :  { %v2079_v3 = vld [vmem:[#allocation2 + $0x80] sm:$0xff]   ;;  %1891 = vmatpush3.bf16.msra.mxu0 %v2078_v2  ;;  %v2083_v7 = vld [vmem:[#allocation2 + $0x88] sm:$0xff]   ;;  %v2086_v10 = vld [vmem:[#allocation2 + $0x10] sm:$0xff]  }
  0x3b   :  { %1913 = vmatpush3.bf16.msra.mxu1 %v2079_v3  ;;  %1892 = vmatprep.subr.bf16.mxu0 %v2080_v4  ;;  %v2087_v11 = vld [vmem:[#allocation2 + $0x90] sm:$0xff]   ;;  %v2088_v12 = vld [vmem:[#allocation2 + $0x58] sm:$0xff]   ;;  %v2092_v16 = vld [vmem:[#allocation2 + $0x60] sm:$0xff]  }
  0x3c   :  { %1914 = vmatprep.subr.bf16.mxu1 %v2081_v5  ;;  %v2089_v13 = vld [vmem:[#allocation2 + $0xd8] sm:$0xff]   ;;  %v2093_v17 = vld [vmem:[#allocation2 + $0xe0] sm:$0xff]   ;;  %v2096_v20 = vld [vmem:[#allocation2 + $0x68] sm:$0xff]  }
  0x3d   :  { %v2090_v14 = vld [vmem:[#allocation2 + $0x18] sm:$0xff]   ;;  %v2094_v18 = vld [vmem:[#allocation2 + $0x20] sm:$0xff]   ;;  %v2097_v21 = vld [vmem:[#allocation2 + $0xe8] sm:$0xff]  }
  0x3e   :  { %1893 = vmatpush3.bf16.msra.mxu0 %v2082_v6  ;;  %v2091_v15 = vld [vmem:[#allocation2 + $0x98] sm:$0xff]   ;;  %v2095_v19 = vld [vmem:[#allocation2 + $0xa0] sm:$0xff]   ;;  %v2098_v22 = vld [vmem:[#allocation2 + $0x28] sm:$0xff]  }
  0x3f   :  { %1915 = vmatpush3.bf16.msra.mxu1 %v2083_v7  ;;  %1894 = vmatprep.subr.bf16.mxu0 %v2084_v8  ;;  %v2099_v23 = vld [vmem:[#allocation2 + $0xa8] sm:$0xff]   ;;  %v2100_v24 = vld [vmem:[#allocation2 + $0x70] sm:$0xff]   ;;  %v2104_v28 = vld [vmem:[#allocation2 + $0x78] sm:$0xff]  }
  0x40   :  { %1916 = vmatprep.subr.bf16.mxu1 %v2085_v9  ;;  %v2101_v25 = vld [vmem:[#allocation2 + $0xf0] sm:$0xff]   ;;  %v2105_v29 = vld [vmem:[#allocation2 + $0xf8] sm:$0xff]   ;;  %v66_v32 = vld [vmem:[%s2423_s0] sm:$0xff] }
  0x41   :  { %v2102_v26 = vld [vmem:[#allocation2 + $0x30] sm:$0xff]   ;;  %v2106_v30 = vld [vmem:[#allocation2 + $0x38] sm:$0xff]   ;;  %v67_v33 = vld [vmem:[%s2423_s0 + $0x8] sm:$0xff]  ;;  %v1727_v34 = vcombine.low %v66_v32, %v66_v32  ;;  %v1728_v35 = vcombine.high %v66_v32, %v66_v32 }
  0x42   :  { %1895 = vmatpush3.bf16.msra.mxu0 %v2086_v10  ;;  %v2103_v27 = vld [vmem:[#allocation2 + $0xb0] sm:$0xff]   ;;  %v2107_v31 = vld [vmem:[#allocation2 + $0xb8] sm:$0xff]   ;;  %v1729_v36 = vcombine.low %v67_v33, %v67_v33  ;;  %v1730_v37 = vcombine.high %v67_v33, %v67_v33  ;;  %v2112_v38 = vld [vmem:[#allocation2 + $0x140] sm:$0xff]  }
  0x43   :  { %1917 = vmatpush3.bf16.msra.mxu1 %v2087_v11  ;;  %1896 = vmatprep.subr.bf16.mxu0 %v2088_v12  ;;  %v2113_v39 = vld [vmem:[#allocation2 + $0x1c0] sm:$0xff]   ;;  %v2116_v42 = vld [vmem:[#allocation2 + $0x148] sm:$0xff]   ;;  %v2120_v46 = vld [vmem:[#allocation2 + $0x150] sm:$0xff]  }
  0x44   :  { %1918 = vmatprep.subr.bf16.mxu1 %v2089_v13  ;;  %647 = vmatprep.mubr.bf16.mxu0 %v1728_v35  ;;  %v2114_v40 = vld [vmem:[#allocation2 + $0x100] sm:$0xff]   ;;  %v2117_v43 = vld [vmem:[#allocation2 + $0x1c8] sm:$0xff]   ;;  %v2121_v47 = vld [vmem:[#allocation2 + $0x1d0] sm:$0xff]   ;;  %v2273_v13 = vmov 0.0  }
  0x45   :  { %687 = vmatprep.mubr.bf16.mxu1 %v1730_v37  ;;  %v2115_v41 = vld [vmem:[#allocation2 + $0x180] sm:$0xff]   ;;  %v2118_v44 = vld [vmem:[#allocation2 + $0x108] sm:$0xff]   ;;  %v2122_v48 = vld [vmem:[#allocation2 + $0x110] sm:$0xff]  }
  0x46   :  { %1897 = vmatpush3.bf16.msra.mxu0 %v2090_v14  ;;  %v2119_v45 = vld [vmem:[#allocation2 + $0x188] sm:$0xff]   ;;  %v2123_v49 = vld [vmem:[#allocation2 + $0x190] sm:$0xff]   ;;  %v2124_v50 = vld [vmem:[#allocation2 + $0x158] sm:$0xff]  }
  0x47   :  { %1919 = vmatpush3.bf16.msra.mxu1 %v2091_v15  ;;  %1898 = vmatprep.subr.bf16.mxu0 %v2092_v16  ;;  %v2125_v51 = vld [vmem:[#allocation2 + $0x1d8] sm:$0xff]   ;;  %v2128_v54 = vld [vmem:[#allocation2 + $0x160] sm:$0xff]   ;;  %v2132_v58 = vld [vmem:[#allocation2 + $0x168] sm:$0xff]  }
  0x48   :  { %1920 = vmatprep.subr.bf16.mxu1 %v2093_v17  ;;  %v2126_v52 = vld [vmem:[#allocation2 + $0x118] sm:$0xff]   ;;  %v2129_v55 = vld [vmem:[#allocation2 + $0x1e0] sm:$0xff]   ;;  %v2133_v59 = vld [vmem:[#allocation2 + $0x1e8] sm:$0xff]  }
  0x49   :  { %v2127_v53 = vld [vmem:[#allocation2 + $0x198] sm:$0xff]   ;;  %v2130_v56 = vld [vmem:[#allocation2 + $0x120] sm:$0xff]   ;;  %v2134_v60 = vld [vmem:[#allocation2 + $0x128] sm:$0xff]  }
  0x4a   :  { %1899 = vmatpush3.bf16.msra.mxu0 %v2094_v18  ;;  %v2131_v57 = vld [vmem:[#allocation2 + $0x1a0] sm:$0xff]   ;;  %v2135_v61 = vld [vmem:[#allocation2 + $0x1a8] sm:$0xff]   ;;  %v2136_v62 = vld [vmem:[#allocation2 + $0x170] sm:$0xff]  }
  0x4b   :  { %1921 = vmatpush3.bf16.msra.mxu1 %v2095_v19  ;;  %1900 = vmatprep.subr.bf16.mxu0 %v2096_v20  ;;  %v2137_v63 = vld [vmem:[#allocation2 + $0x1f0] sm:$0xff]   ;;  %v2140_v2 = vld [vmem:[#allocation2 + $0x178] sm:$0xff]   ;;  %v2148_v12 = vld [vmem:[#allocation7] sm:$0xff]  }
  0x4c   :  { %1922 = vmatprep.subr.bf16.mxu1 %v2097_v21  ;;  %v2138_v0 = vld [vmem:[#allocation2 + $0x130] sm:$0xff]   ;;  %v2141_v3 = vld [vmem:[#allocation2 + $0x1f8] sm:$0xff]   ;;  %v2149_v14 = vld [vmem:[#allocation7 + $0x8] sm:$0xff]  }
  0x4d   :  { %v2139_v1 = vld [vmem:[#allocation2 + $0x1b0] sm:$0xff]   ;;  %v2142_v4 = vld [vmem:[#allocation2 + $0x138] sm:$0xff]   ;;  %v2152_v17 = vld [vmem:[#allocation7 + $0x20] sm:$0xff]  }
  0x4e   :  { %1901 = vmatpush3.bf16.msra.mxu0 %v2098_v22  ;;  %v2143_v5 = vld [vmem:[#allocation2 + $0x1b8] sm:$0xff]   ;;  %v68_v6 = vld [vmem:[%s2423_s0 + $0x10] sm:$0xff]  ;;  %v2153_v18 = vld [vmem:[#allocation7 + $0x28] sm:$0xff]  }
  0x4f   :  { %1923 = vmatpush3.bf16.msra.mxu1 %v2099_v23  ;;  %1902 = vmatprep.subr.bf16.mxu0 %v2100_v24  ;;  %v1731_v7 = vcombine.low %v68_v6, %v68_v6  ;;  %v1732_v8 = vcombine.high %v68_v6, %v68_v6  ;;  %v69_v9 = vld [vmem:[%s2423_s0 + $0x18] sm:$0xff]  ;;  %v2150_v15 = vld [vmem:[#allocation7 + $0x10] sm:$0xff]   ;;  %v2156_v21 = vld [vmem:[#allocation7 + $0x40] sm:$0xff]  }
  0x50   :  { %1924 = vmatprep.subr.bf16.mxu1 %v2101_v25  ;;  %v1733_v10 = vcombine.low %v69_v9, %v69_v9  ;;  %v1734_v11 = vcombine.high %v69_v9, %v69_v9  ;;  %v2151_v16 = vld [vmem:[#allocation7 + $0x18] sm:$0xff]   ;;  %v2154_v19 = vld [vmem:[#allocation7 + $0x30] sm:$0xff]   ;;  %v2157_v22 = vld [vmem:[#allocation7 + $0x48] sm:$0xff]  }
  0x51   :  { %v2155_v20 = vld [vmem:[#allocation7 + $0x38] sm:$0xff]   ;;  %v2158_v23 = vld [vmem:[#allocation7 + $0x50] sm:$0xff]   ;;  %v2160_v25 = vld [vmem:[#allocation7 + $0x60] sm:$0xff]  }
  0x52   :  { %1903 = vmatpush3.bf16.msra.mxu0 %v2102_v26  ;;  %v2159_v24 = vld [vmem:[#allocation7 + $0x58] sm:$0xff]   ;;  %v2161_v26 = vld [vmem:[#allocation7 + $0x68] sm:$0xff]   ;;  %v2170_v6 = vld [vmem:[#allocation7 + $0xb0] sm:$0xff]  }
  0x53   :  { %1925 = vmatpush3.bf16.msra.mxu1 %v2103_v27  ;;  %1904 = vmatprep.subr.bf16.mxu0 %v2104_v28  ;;  %v1116_v9 = vld [vmem:[#allocation5 + $0x20] sm:$0xff] }
  0x54   :  { %1926 = vmatprep.subr.bf16.mxu1 %v2105_v29  ;;  %v1726_v29 = vld [vmem:[%s2427_s4] ss:$0 sm:$0xff] }
  0x56   :  { %1905 = vmatpush3.bf16.msra.mxu0 %v2106_v30 }
  0x57   :  { %1927 = vmatpush3.bf16.msra.mxu1 %v2107_v31  ;;  %1934 = vmatprep.subr.bf16.mxu0 %v2112_v38 }
  0x58   :  { %1956 = vmatprep.subr.bf16.mxu1 %v2113_v39 }
  0x59   :  { %648 = vmatmul.mubr.bf16.vlgmr.msra.gmra.mrb[0].mxu0 %v1727_v34 }
  0x5a   :  { %688 = vmatmul.mubr.bf16.vlgmr.msra.gmra.mrb[0].mxu1 %v1729_v36  ;;  %1935 = vmatpush3.bf16.msra.mxu0 %v2114_v40 }
  0x5b   :  { %1957 = vmatpush3.bf16.msra.mxu1 %v2115_v41  ;;  %1936 = vmatprep.subr.bf16.mxu0 %v2116_v42 }
  0x5c   :  { %1958 = vmatprep.subr.bf16.mxu1 %v2117_v43  ;;  %727 = vmatprep.mubr.bf16.mxu0 %v1732_v8  ;;  %v1112_v8 = vld [vmem:[#allocation5] sm:$0xff] }
  0x5d   :  { %767 = vmatprep.mubr.bf16.mxu1 %v1734_v11  ;;  %v1826_v11 = vcombine.low %v1112_v8, %v1116_v9 }
  0x5e   :  { %1937 = vmatpush3.bf16.msra.mxu0 %v2118_v44 }
  0x5f   :  { %1959 = vmatpush3.bf16.msra.mxu1 %v2119_v45  ;;  %1938 = vmatprep.subr.bf16.mxu0 %v2120_v46 }
  0x60   :  { %1960 = vmatprep.subr.bf16.mxu1 %v2121_v47 }
  0x62   :  { %1939 = vmatpush3.bf16.msra.mxu0 %v2122_v48 }
  0x63   :  { %1961 = vmatpush3.bf16.msra.mxu1 %v2123_v49  ;;  %1940 = vmatprep.subr.bf16.mxu0 %v2124_v50 }
  0x64   :  { %1962 = vmatprep.subr.bf16.mxu1 %v2125_v51 }
  0x66   :  { %1941 = vmatpush3.bf16.msra.mxu0 %v2126_v52 }
  0x67   :  { %1963 = vmatpush3.bf16.msra.mxu1 %v2127_v53  ;;  %1942 = vmatprep.subr.bf16.mxu0 %v2128_v54  ;;  %v2162_v54 = vld [vmem:[#allocation7 + $0x70] sm:$0xff]  }
  0x68   :  { %1964 = vmatprep.subr.bf16.mxu1 %v2129_v55  ;;  %v2163_v55 = vld [vmem:[#allocation7 + $0x78] sm:$0xff]  }
  0x6a   :  { %1943 = vmatpush3.bf16.msra.mxu0 %v2130_v56  ;;  %v2164_v56 = vld [vmem:[#allocation7 + $0x80] sm:$0xff]  }
  0x6b   :  { %1965 = vmatpush3.bf16.msra.mxu1 %v2131_v57  ;;  %1944 = vmatprep.subr.bf16.mxu0 %v2132_v58  ;;  %v2165_v57 = vld [vmem:[#allocation7 + $0x88] sm:$0xff]   ;;  %v2166_v58 = vld [vmem:[#allocation7 + $0x90] sm:$0xff]  }
  0x6c   :  { %1966 = vmatprep.subr.bf16.mxu1 %v2133_v59  ;;  %v2167_v59 = vld [vmem:[#allocation7 + $0x98] sm:$0xff]  }
  0x6e   :  { %1945 = vmatpush3.bf16.msra.mxu0 %v2134_v60  ;;  %v2168_v60 = vld [vmem:[#allocation7 + $0xa0] sm:$0xff]  }
  0x6f   :  { %1967 = vmatpush3.bf16.msra.mxu1 %v2135_v61  ;;  %1946 = vmatprep.subr.bf16.mxu0 %v2136_v62  ;;  %v2169_v61 = vld [vmem:[#allocation7 + $0xa8] sm:$0xff]   ;;  %v1799_v62 = vld [vmem:[%s2427_s4 + $0x1] ss:$0 sm:$0xff] }
  0x70   :  { %1968 = vmatprep.subr.bf16.mxu1 %v2137_v63 }
  0x72   :  { %1947 = vmatpush3.bf16.msra.mxu0 %v2138_v0 }
  0x73   :  { %1969 = vmatpush3.bf16.msra.mxu1 %v2139_v1  ;;  %1948 = vmatprep.subr.bf16.mxu0 %v2140_v2 }
  0x74   :  { %1970 = vmatprep.subr.bf16.mxu1 %v2141_v3 }
  0x76   :  { %1949 = vmatpush3.bf16.msra.mxu0 %v2142_v4 }
  0x77   :  { %1971 = vmatpush3.bf16.msra.mxu1 %v2143_v5  ;;  %2005 = vmatprep.subr.bf16.mxu0 %v2273_v13 }
  0x78   :  { %2025 = vmatprep.subr.bf16.mxu1 %v2273_v13 }
  0x79   :  { %728 = vmatmul.mubr.bf16.vlgmr.msra.gmra.mrb[4].mxu0 %v1731_v7  ;;  %v2171_v7 = vld [vmem:[#allocation7 + $0xb8] sm:$0xff]  }
  0x7a   :  { %768 = vmatmul.mubr.bf16.vlgmr.msra.gmra.mrb[4].mxu1 %v1733_v10  ;;  %2006 = vmatpush3.bf16.msra.mxu0 %v2148_v12  ;;  %v1113_v10 = vld [vmem:[#allocation5 + $0x8] sm:$0xff]  ;;  %v1827_v12 = vcombine.high %v1112_v8, %v1116_v9  ;;  %v1168_v8 = vld [vmem:[#allocation5 + $0x1c0] sm:$0xff] }
  0x7b   :  { %2007 = vmatprep.subr.bf16.mxu0 %v2273_v13  ;;  %2021 = vmatprep.mubr.msk.bf16.mxu0 %vm2274_vm0, %v2273_v13  ;;  %v1172_v9 = vld [vmem:[#allocation5 + $0x1e0] sm:$0xff] }
  0x7c   :  { %2041 = vmatprep.mubr.msk.bf16.mxu1 %vm2274_vm0, %v2273_v13  ;;  %2026 = vmatpush3.bf16.msra.mxu1 %v2156_v21  ;;  %v1128_v21 = vld [vmem:[#allocation5 + $0x80] sm:$0xff] }
  0x7d   :  { %2027 = vmatprep.subr.bf16.mxu1 %v2273_v13 }
  0x7e   :  { %2008 = vmatpush3.bf16.msra.mxu0 %v2149_v14  ;;  %v1117_v14 = vld [vmem:[#allocation5 + $0x28] sm:$0xff] }
  0x7f   :  { %2009 = vmatprep.subr.bf16.mxu0 %v2273_v13 }
  0x80   :  { %2028 = vmatpush3.bf16.msra.mxu1 %v2157_v22 }
  0x81   :  { %2029 = vmatprep.subr.bf16.mxu1 %v2273_v13 }
  0x82   :  { %2010 = vmatpush3.bf16.msra.mxu0 %v2150_v15  ;;  %v1120_v15 = vld [vmem:[#allocation5 + $0x40] sm:$0xff] }
  0x83   :  { %2011 = vmatprep.subr.bf16.mxu0 %v2273_v13 }
  0x84   :  { %2030 = vmatpush3.bf16.msra.mxu1 %v2158_v23 }
  0x85   :  { %2031 = vmatprep.subr.bf16.mxu1 %v2273_v13 }
  0x86   :  { %2012 = vmatpush3.bf16.msra.mxu0 %v2151_v16  ;;  %v1124_v16 = vld [vmem:[#allocation5 + $0x60] sm:$0xff] }
  0x87   :  { %2013 = vmatprep.subr.bf16.mxu0 %v2273_v13 }
  0x88   :  { %2032 = vmatpush3.bf16.msra.mxu1 %v2159_v24  ;;  %v1136_v24 = vld [vmem:[#allocation5 + $0xc0] sm:$0xff] }
  0x89   :  { %2033 = vmatprep.subr.bf16.mxu1 %v2273_v13 }
  0x8a   :  { %2014 = vmatpush3.bf16.msra.mxu0 %v2152_v17  ;;  %v1828_v17 = vcombine.low %v1113_v10, %v1117_v14 }
  0x8b   :  { %2015 = vmatprep.subr.bf16.mxu0 %v2273_v13 }
  0x8c   :  { %2034 = vmatpush3.bf16.msra.mxu1 %v2160_v25  ;;  %v1140_v25 = vld [vmem:[#allocation5 + $0xe0] sm:$0xff] }
  0x8d   :  { %2035 = vmatprep.subr.bf16.mxu1 %v2273_v13 }
  0x8e   :  { %2016 = vmatpush3.bf16.msra.mxu0 %v2153_v18  ;;  %v1829_v18 = vcombine.high %v1113_v10, %v1117_v14  ;;  %v1169_v10 = vld [vmem:[#allocation5 + $0x1c8] sm:$0xff]  ;;  %v1882_v14 = vcombine.low %v1168_v8, %v1172_v9 }
  0x8f   :  { %2017 = vmatprep.subr.bf16.mxu0 %v2273_v13 }
  0x90   :  { %2036 = vmatpush3.bf16.msra.mxu1 %v2161_v26  ;;  %v1851_v26 = vcombine.high %v1136_v24, %v1140_v25 }
  0x91   :  { %2037 = vmatprep.subr.bf16.mxu1 %v2273_v13 }
  0x92   :  { %2018 = vmatpush3.bf16.msra.mxu0 %v2154_v19  ;;  %v1835_v19 = vcombine.high %v1120_v15, %v1124_v16 }
  0x93   :  { %2019 = vmatprep.subr.bf16.mxu0 %v2273_v13 }
  0x94   :  { %2038 = vmatpush3.bf16.msra.mxu1 %v2162_v54 }
  0x95   :  { %2039 = vmatprep.subr.bf16.mxu1 %v2273_v13 }
  0x96   :  { %2020 = vmatpush3.bf16.msra.mxu0 %v2155_v20  ;;  %v1834_v20 = vcombine.low %v1120_v15, %v1124_v16 }
  0x97   :  { %2045 = vmatprep.subr.bf16.mxu0 %v2273_v13 }
  0x98   :  { %2040 = vmatpush3.bf16.msra.mxu1 %v2163_v55  ;;  %v1137_v55 = vld [vmem:[#allocation5 + $0xc8] sm:$0xff] }
  0x99   :  { %1538 = vmatprep.subr.bf16.mxu1 %v1827_v12  ;;  %v1173_v12 = vld [vmem:[#allocation5 + $0x1e8] sm:$0xff] }
  0x9a   :  { %v1884_v15 = vcombine.low %v1169_v10, %v1173_v12  ;;  %v1885_v16 = vcombine.high %v1169_v10, %v1173_v12  ;;  %v1167_v10 = vld [vmem:[#allocation5 + $0x1b8] sm:$0xff] }
 0x12c   :  { %v1906_v27 = vpop.f32.mrb[0].mxu0 }
 0x12d   :  { %v1928_v28 = vpop.f32.mrb[0].mxu1  ;;  %v1907_v30 = vpop.f32.mrb[1].mxu0 }
 0x12e   :  { %v1929_v31 = vpop.f32.mrb[1].mxu1  ;;  %v1908_v32 = vadd.f32 %v1907_v30, %v1906_v27  ;;  %v1909_v34 = vpop.f32.mrb[2].mxu0  ;;  %v1850_v27 = vcombine.low %v1136_v24, %v1140_v25  ;;  %v2275_v24 = vmov 0   ;;  %v1817_v25 = vld [vmem:[%s2427_s4 + $0x3] ss:$0 sm:$0xff] }
 0x12f   :  { %v1930_v33 = vadd.f32 %v1929_v31, %v1928_v28  ;;  %v1931_v35 = vpop.f32.mrb[2].mxu1  ;;  %v1910_v36 = vpop.f32.mrb[3].mxu0  ;;  %v1144_v28 = vld [vmem:[#allocation5 + $0x100] sm:$0xff] }
 0x130   :  { %v1932_v37 = vpop.f32.mrb[3].mxu1  ;;  %v650_v38 = vadd.f32 %v1908_v32, %v1726_v29  ;;  %v1148_v29 = vld [vmem:[#allocation5 + $0x120] sm:$0xff] }
 0x131   :  { %v1859_v30 = vcombine.high %v1144_v28, %v1148_v29  ;;  %v1858_v31 = vcombine.low %v1144_v28, %v1148_v29  ;;  %v1152_v32 = vld [vmem:[#allocation5 + $0x140] sm:$0xff]  ;;  %v1122_v29 = vld [vmem:[#allocation5 + $0x50] sm:$0xff] }
 0x132   :  { %v690_v39 = vadd.f32 %v1930_v33, %v650_v38  ;;  %v1156_v33 = vld [vmem:[#allocation5 + $0x160] sm:$0xff] }
 0x133   :  { %v1867_v34 = vcombine.high %v1152_v32, %v1156_v33  ;;  %v1866_v35 = vcombine.low %v1152_v32, %v1156_v33  ;;  %v1160_v36 = vld [vmem:[#allocation5 + $0x180] sm:$0xff]  ;;  %v1123_v32 = vld [vmem:[#allocation5 + $0x58] sm:$0xff] }
 0x134   :  { %v1164_v37 = vld [vmem:[#allocation5 + $0x1a0] sm:$0xff]  ;;  %v1127_v33 = vld [vmem:[#allocation5 + $0x78] sm:$0xff] }
 0x135   :  { %v1875_v38 = vcombine.high %v1160_v36, %v1164_v37 }
 0x14c   :  { %v1950_v40 = vpop.f32.mrb[4].mxu0 }
 0x14d   :  { %v1972_v41 = vpop.f32.mrb[4].mxu1  ;;  %v1951_v42 = vpop.f32.mrb[5].mxu0 }
 0x14e   :  { %v1973_v43 = vpop.f32.mrb[5].mxu1  ;;  %v1952_v44 = vadd.f32 %v1951_v42, %v1950_v40  ;;  %v1953_v46 = vpop.f32.mrb[6].mxu0  ;;  %v1808_v40 = vld [vmem:[%s2427_s4 + $0x2] ss:$0 sm:$0xff] }
 0x14f   :  { %v1974_v45 = vadd.f32 %v1973_v43, %v1972_v41  ;;  %v1975_v47 = vpop.f32.mrb[6].mxu1  ;;  %v1954_v48 = vpop.f32.mrb[7].mxu0  ;;  %v1125_v46 = vld [vmem:[#allocation5 + $0x68] sm:$0xff] }
 0x150   :  { %v1976_v49 = vpop.f32.mrb[7].mxu1  ;;  %v730_v50 = vadd.f32 %v1952_v44, %v690_v39  ;;  %v1874_v39 = vcombine.low %v1160_v36, %v1164_v37 }
 0x152   :  { %v770_v51 = vadd.f32 %v1974_v45, %v730_v50  ;;  %v1121_v45 = vld [vmem:[#allocation5 + $0x48] sm:$0xff] }
 0x153   :  { %v1837_v50 = vcombine.high %v1121_v45, %v1125_v46 }
 0x154   :  { %v775_v52 = vmax.f32 %v770_v51, 0.0  ;;  %v1129_v51 = vld [vmem:[#allocation5 + $0x88] sm:$0xff] }
 0x156   :  { %v776_v53 = vpack.c.bf16 %v775_v52, %v775_v52  ;;  %v1133_v52 = vld [vmem:[#allocation5 + $0xa8] sm:$0xff] }
 0x157   :  { %v1845_v54 = vcombine.high %v1129_v51, %v1133_v52 }
 0x158   :  { %2022 = vmatmul.mubr.bf16.vlgmr.msra.gmra.mrb[8].mxu0 %v776_v53  ;;  %v1836_v53 = vcombine.low %v1121_v45, %v1125_v46 }
 0x159   :  { %2061 = vmatprep.mubr.msk.bf16.mxu0 %vm2274_vm0, %v2273_v13  ;;  %2046 = vmatpush3.bf16.msra.mxu0 %v2164_v56  ;;  %v1141_v56 = vld [vmem:[#allocation5 + $0xe8] sm:$0xff] }
 0x15a   :  { %2047 = vmatprep.subr.bf16.mxu0 %v2273_v13 }
 0x15d   :  { %2048 = vmatpush3.bf16.msra.mxu0 %v2165_v57  ;;  %v1844_v57 = vcombine.low %v1129_v51, %v1133_v52 }
 0x15e   :  { %2049 = vmatprep.subr.bf16.mxu0 %v2273_v13 }
 0x161   :  { %2050 = vmatpush3.bf16.msra.mxu0 %v2166_v58  ;;  %v1853_v58 = vcombine.high %v1137_v55, %v1141_v56 }
 0x162   :  { %2051 = vmatprep.subr.bf16.mxu0 %v2273_v13 }
 0x165   :  { %2052 = vmatpush3.bf16.msra.mxu0 %v2167_v59  ;;  %v1145_v59 = vld [vmem:[#allocation5 + $0x108] sm:$0xff] }
 0x166   :  { %2053 = vmatprep.subr.bf16.mxu0 %v2273_v13 }
 0x169   :  { %2054 = vmatpush3.bf16.msra.mxu0 %v2168_v60  ;;  %v1149_v60 = vld [vmem:[#allocation5 + $0x128] sm:$0xff] }
 0x16a   :  { %2055 = vmatprep.subr.bf16.mxu0 %v2273_v13 }
 0x16d   :  { %2056 = vmatpush3.bf16.msra.mxu0 %v2169_v61  ;;  %v1852_v61 = vcombine.low %v1137_v55, %v1141_v56  ;;  %v1146_v55 = vld [vmem:[#allocation5 + $0x110] sm:$0xff] }
 0x16e   :  { %2057 = vmatprep.subr.bf16.mxu0 %v2273_v13  ;;  %v1150_v56 = vld [vmem:[#allocation5 + $0x130] sm:$0xff] }
 0x171   :  { %2058 = vmatpush3.bf16.msra.mxu0 %v2170_v6 }
 0x172   :  { %2059 = vmatprep.subr.bf16.mxu0 %v2273_v13  ;;  %v1132_v13 = vld [vmem:[#allocation5 + $0xa0] sm:$0xff] }
 0x173   :  { %v1843_v22 = vcombine.high %v1128_v21, %v1132_v13  ;;  %v1842_v23 = vcombine.low %v1128_v21, %v1132_v13  ;;  %v1119_v21 = vld [vmem:[#allocation5 + $0x38] sm:$0xff] }
 0x175   :  { %2060 = vmatpush3.bf16.msra.mxu0 %v2171_v7 }
 0x176   :  { %1579 = vmatprep.subr.bf16.mxu0 %v1829_v18  ;;  %v1118_v18 = vld [vmem:[#allocation5 + $0x30] sm:$0xff] }
 0x22b   :  { %v880_v63 = vpop.f32.mrb[8].mxu0 }
 0x22c   :  { %v881_v0 = vadd.f32 %v1799_v62, %v880_v63  ;;  %v2023_v1 = vpop.f32.mrb[9].mxu0  ;;  %v1861_v62 = vcombine.high %v1145_v59, %v1149_v60  ;;  %v1153_v63 = vld [vmem:[#allocation5 + $0x148] sm:$0xff] }
 0x22d   :  { %v883_v2 = vpop.f32.mrb[10].mxu0  ;;  %v1860_v1 = vcombine.low %v1145_v59, %v1149_v60 }
 0x22e   :  { %v886_v3 = vmax.f32 %v881_v0, 0.0  ;;  %v2024_v4 = vpop.f32.mrb[11].mxu0  ;;  %v1157_v0 = vld [vmem:[#allocation5 + $0x168] sm:$0xff] }
 0x22f   :  { %v1869_v2 = vcombine.high %v1153_v63, %v1157_v0  ;;  %v1165_v4 = vld [vmem:[#allocation5 + $0x1a8] sm:$0xff] }
 0x230   :  { %v887_v5 = vpack.c.bf16 %v886_v3, %v886_v3  ;;  %v1161_v3 = vld [vmem:[#allocation5 + $0x188] sm:$0xff] }
 0x231   :  { %v1877_v6 = vcombine.high %v1161_v3, %v1165_v4  ;;  %v1876_v7 = vcombine.low %v1161_v3, %v1165_v4  ;;  %v1862_v3 = vcombine.low %v1146_v55, %v1150_v56 }
 0x232   :  { %2042 = vmatmul.mubr.bf16.vlgmr.msra.gmra.mrb[8].mxu1 %v887_v5  ;;  %v1868_v5 = vcombine.low %v1153_v63, %v1157_v0  ;;  %v1154_v63 = vld [vmem:[#allocation5 + $0x150] sm:$0xff] }
 0x233   :  { %1539 = vmatpush1.bf16.msra.mxu1 %v1826_v11  ;;  %v1883_v11 = vcombine.high %v1168_v8, %v1172_v9  ;;  %1570 = vmatprep.mubr.bf16.mxu1 %v2275_v24  ;;  %v1158_v0 = vld [vmem:[#allocation5 + $0x170] sm:$0xff]  ;;  %v1163_v9 = vld [vmem:[#allocation5 + $0x198] sm:$0xff] }
 0x234   :  { %1540 = vmatprep.subr.bf16.mxu1 %v1835_v19  ;;  %v1115_v19 = vld [vmem:[#allocation5 + $0x18] sm:$0xff]  ;;  %v1166_v8 = vld [vmem:[#allocation5 + $0x1b0] sm:$0xff] }
 0x237   :  { %1541 = vmatpush1.bf16.msra.mxu1 %v1834_v20 }
 0x238   :  { %1542 = vmatprep.subr.bf16.mxu1 %v1843_v22  ;;  %v1832_v22 = vcombine.low %v1115_v19, %v1119_v21 }
 0x23b   :  { %1543 = vmatpush1.bf16.msra.mxu1 %v1842_v23  ;;  %v1833_v23 = vcombine.high %v1115_v19, %v1119_v21  ;;  %v1175_v19 = vld [vmem:[#allocation5 + $0x1f8] sm:$0xff]  ;;  %v1880_v21 = vcombine.low %v1163_v9, %v1167_v10 }
 0x23c   :  { %1544 = vmatprep.subr.bf16.mxu1 %v1851_v26 }
 0x23f   :  { %1545 = vmatpush1.bf16.msra.mxu1 %v1850_v27 }
 0x240   :  { %1546 = vmatprep.subr.bf16.mxu1 %v1859_v30 }
 0x243   :  { %1547 = vmatpush1.bf16.msra.mxu1 %v1858_v31  ;;  %v1126_v31 = vld [vmem:[#allocation5 + $0x70] sm:$0xff] }
 0x244   :  { %1548 = vmatprep.subr.bf16.mxu1 %v1867_v34  ;;  %v1839_v37 = vcombine.high %v1122_v29, %v1126_v31 }
 0x247   :  { %1549 = vmatpush1.bf16.msra.mxu1 %v1866_v35 }
 0x248   :  { %1550 = vmatprep.subr.bf16.mxu1 %v1875_v38  ;;  %v1841_v38 = vcombine.high %v1123_v32, %v1127_v33 }
 0x24b   :  { %1551 = vmatpush1.bf16.msra.mxu1 %v1874_v39  ;;  %v1130_v39 = vld [vmem:[#allocation5 + $0x90] sm:$0xff] }
 0x24c   :  { %1552 = vmatprep.subr.bf16.mxu1 %v1883_v11  ;;  %v1870_v11 = vcombine.low %v1154_v63, %v1158_v0 }
 0x24f   :  { %1553 = vmatpush1.bf16.msra.mxu1 %v1882_v14 }
 0x305   :  { %v992_v41 = vpop.f32.mrb[8].mxu1 }
 0x306   :  { %v993_v42 = vadd.f32 %v1808_v40, %v992_v41  ;;  %v2043_v43 = vpop.f32.mrb[9].mxu1  ;;  %v1134_v40 = vld [vmem:[#allocation5 + $0xb0] sm:$0xff]  ;;  %v1131_v41 = vld [vmem:[#allocation5 + $0x98] sm:$0xff] }
 0x307   :  { %v995_v44 = vpop.f32.mrb[10].mxu1  ;;  %v1838_v43 = vcombine.low %v1122_v29, %v1126_v31  ;;  %v1847_v45 = vcombine.high %v1130_v39, %v1134_v40  ;;  %v1846_v51 = vcombine.low %v1130_v39, %v1134_v40  ;;  %v1176_v29 = vld [vmem:[%s2428_s5] sm:$0xff]  ;;  %s2276_s5 = smov [#allocation8]  }
 0x308   :  { %v998_v47 = vmax.f32 %v993_v42, 0.0  ;;  %v2044_v48 = vpop.f32.mrb[11].mxu1  ;;  %v1135_v42 = vld [vmem:[#allocation5 + $0xb8] sm:$0xff]  ;;  %v1840_v44 = vcombine.low %v1123_v32, %v1127_v33  ;;  %s1716_s25 = sshll.u32 %s2276_s5, 4  ;;  %s1717_s25 = int_to_ptr.vmem [resolvable:$true] %s1716_s25 }
 0x309   :  { %v1849_v46 = vcombine.high %v1131_v41, %v1135_v42  ;;  %v1142_v48 = vld [vmem:[#allocation5 + $0xf0] sm:$0xff]  ;;  %v1848_v52 = vcombine.low %v1131_v41, %v1135_v42  ;;  %s2238_s26 = scalar_lea.vmem %s1717_s25, 1024  ;;  %p2243_p11 = scmp.lt.s32.totalorder %s1717_s25, %s1717_s25 }
 0x30a   :  { %v999_v49 = vpack.c.bf16 %v998_v47, %v998_v47  ;;  %v1138_v47 = vld [vmem:[#allocation5 + $0xd0] sm:$0xff]  ;;  %p2239_p10 = scmp.ne.s32.totalorder %s1717_s25, %s2238_s26  ;;  %p2244_p12 = scmp.lt.s32.totalorder %s2238_s26, %s2238_s26 }
 0x30b   :  { %v1854_v59 = vcombine.low %v1138_v47, %v1142_v48 }
 0x30c   :  { %2062 = vmatmul.mubr.bf16.vlgmr.msra.gmra.mrb[12].mxu0 %v999_v49  ;;  %v1139_v49 = vld [vmem:[#allocation5 + $0xd8] sm:$0xff]  ;;  %p2245_p13 = por %p2244_p12, %p2243_p11 }
 0x30d   :  { %1580 = vmatpush1.bf16.msra.mxu0 %v1828_v17  ;;  %v1114_v17 = vld [vmem:[#allocation5 + $0x10] sm:$0xff]  ;;  %1611 = vmatprep.mubr.bf16.mxu0 %v2275_v24 }
 0x30e   :  { %1581 = vmatprep.subr.bf16.mxu0 %v1837_v50  ;;  %v1831_v20 = vcombine.high %v1114_v17, %v1118_v18  ;;  %v1830_v13 = vcombine.low %v1114_v17, %v1118_v18  ;;  %v1143_v50 = vld [vmem:[#allocation5 + $0xf8] sm:$0xff]  ;;  %v1174_v17 = vld [vmem:[#allocation5 + $0x1f0] sm:$0xff]  ;;  %p2246_p0 = pnand %p2245_p13, %p2239_p10 }
 0x30f   :  { %v1856_v60 = vcombine.low %v1139_v49, %v1143_v50  ;;  %v1171_v18 = vld [vmem:[#allocation5 + $0x1d8] sm:$0xff] }
 0x310   :  { %1620 = vmatprep.subr.bf16.mxu1 %v1831_v20 }
 0x311   :  { %1582 = vmatpush1.bf16.msra.mxu0 %v1836_v53  ;;  %v1855_v53 = vcombine.high %v1138_v47, %v1142_v48 }
 0x312   :  { %1583 = vmatprep.subr.bf16.mxu0 %v1845_v54  ;;  %v1857_v54 = vcombine.high %v1139_v49, %v1143_v50 }
 0x315   :  { %1584 = vmatpush1.bf16.msra.mxu0 %v1844_v57  ;;  %v1147_v57 = vld [vmem:[#allocation5 + $0x118] sm:$0xff] }
 0x316   :  { %1585 = vmatprep.subr.bf16.mxu0 %v1853_v58  ;;  %v1151_v58 = vld [vmem:[#allocation5 + $0x138] sm:$0xff] }
 0x317   :  { %v1864_v4 = vcombine.low %v1147_v57, %v1151_v58 }
 0x319   :  { %1586 = vmatpush1.bf16.msra.mxu0 %v1852_v61  ;;  %v1863_v61 = vcombine.high %v1146_v55, %v1150_v56 }
 0x31a   :  { %1587 = vmatprep.subr.bf16.mxu0 %v1861_v62  ;;  %v1865_v62 = vcombine.high %v1147_v57, %v1151_v58 }
 0x31d   :  { %1588 = vmatpush1.bf16.msra.mxu0 %v1860_v1  ;;  %v1155_v1 = vld [vmem:[#allocation5 + $0x158] sm:$0xff] }
 0x31e   :  { %1589 = vmatprep.subr.bf16.mxu0 %v1869_v2  ;;  %v1159_v2 = vld [vmem:[#allocation5 + $0x178] sm:$0xff] }
 0x31f   :  { %v1872_v12 = vcombine.low %v1155_v1, %v1159_v2 }
 0x321   :  { %1590 = vmatpush1.bf16.msra.mxu0 %v1868_v5  ;;  %v1871_v5 = vcombine.high %v1154_v63, %v1158_v0 }
 0x322   :  { %1591 = vmatprep.subr.bf16.mxu0 %v1877_v6  ;;  %v1873_v6 = vcombine.high %v1155_v1, %v1159_v2 }
 0x325   :  { %1592 = vmatpush1.bf16.msra.mxu0 %v1876_v7  ;;  %v1162_v7 = vld [vmem:[#allocation5 + $0x190] sm:$0xff] }
 0x326   :  { %1593 = vmatprep.subr.bf16.mxu0 %v1885_v16  ;;  %v1879_v14 = vcombine.high %v1162_v7, %v1166_v8  ;;  %v1170_v16 = vld [vmem:[#allocation5 + $0x1d0] sm:$0xff]  ;;  %v1878_v20 = vcombine.low %v1162_v7, %v1166_v8 }
 0x329   :  { %1594 = vmatpush1.bf16.msra.mxu0 %v1884_v15  ;;  %v1881_v15 = vcombine.high %v1163_v9, %v1167_v10 }
 0x32a   :  { %1661 = vmatprep.subr.bf16.mxu0 %v1833_v23  ;;  %v1886_v23 = vcombine.low %v1170_v16, %v1174_v17 }
 0x3df   :  { %v1104_v26 = vpop.f32.mrb[12].mxu0 }
 0x3e0   :  { %v1105_v27 = vadd.f32 %v1817_v25, %v1104_v26  ;;  %v2063_v28 = vpop.f32.mrb[13].mxu0  ;;  %v1178_v25 = vlaneseq }
 0x3e1   :  { %v1107_v30 = vpop.f32.mrb[14].mxu0 }
 0x3e2   :  { %v1110_v34 = vmax.f32 %v1105_v27, 0.0  ;;  %v2064_v35 = vpop.f32.mrb[15].mxu0  ;;  %v1179_v26 = vshrl.u32 %v1178_v25, 7 }
 0x3e4   :  { %v2402_v36 = vpack.c.bf16 %v1110_v34, %v1110_v34  ;;  %v1180_v27 = vsub.s32 0, %v1179_v26  ;;  %v1188_v28 = vsub.s32 2, %v1179_v26  ;;  %v1184_v30 = vsub.s32 1, %v1179_v26 }
 0x3e5   :  { %v1192_v31 = vsub.s32 3, %v1179_v26  ;;  %v1196_v48 = vsub.s32 4, %v1179_v26  ;;  %v1204_v49 = vsub.s32 6, %v1179_v26  ;;  %v1200_v50 = vsub.s32 5, %v1179_v26 }
 0x3e6   :  { %1571 = vmatmul.mubr.bf16.vlgmr.msra.gmra.mrb[12].mxu1 %v2402_v36  ;;  %1612 = vmatmul.mubr.bf16.vlgmr.msra.gmra.mrb[16].mxu0 %v2402_v36  ;;  %v1181_v32 = vrot.slane %v1176_v29, %v1180_v27  ;;  %v1189_v33 = vrot.slane %v1176_v29, %v1188_v28  ;;  %v1185_v34 = vrot.slane %v1176_v29, %v1184_v30 }
 0x3e7   :  { %1621 = vmatpush1.bf16.msra.mxu1 %v1830_v13  ;;  %1662 = vmatpush1.bf16.msra.mxu0 %v1832_v22  ;;  %v1887_v13 = vcombine.high %v1170_v16, %v1174_v17  ;;  %v1889_v22 = vcombine.high %v1171_v18, %v1175_v19  ;;  %v1193_v35 = vrot.slane %v1176_v29, %v1192_v31 }
 0x3e8   :  { %1622 = vmatprep.subr.bf16.mxu1 %v1839_v37  ;;  %1663 = vmatprep.subr.bf16.mxu0 %v1841_v38 }
 0x3e9   :  { %1652 = vmatprep.mubr.bf16.mxu1 %v2275_v24  ;;  %1693 = vmatprep.mubr.bf16.mxu0 %v2275_v24  ;;  %v1888_v24 = vcombine.low %v1171_v18, %v1175_v19 }
 0x3eb   :  { %1623 = vmatpush1.bf16.msra.mxu1 %v1838_v43  ;;  %1664 = vmatpush1.bf16.msra.mxu0 %v1840_v44 }
 0x3ec   :  { %1624 = vmatprep.subr.bf16.mxu1 %v1847_v45  ;;  %1665 = vmatprep.subr.bf16.mxu0 %v1849_v46 }
 0x3ef   :  { %1625 = vmatpush1.bf16.msra.mxu1 %v1846_v51  ;;  %1666 = vmatpush1.bf16.msra.mxu0 %v1848_v52  ;;  %v1208_v51 = vsub.s32 7, %v1179_v26  ;;  %v1197_v52 = vrot.slane %v1176_v29, %v1196_v48 }
 0x3f0   :  { %1626 = vmatprep.subr.bf16.mxu1 %v1855_v53  ;;  %1667 = vmatprep.subr.bf16.mxu0 %v1857_v54  ;;  %v1205_v53 = vrot.slane %v1176_v29, %v1204_v49  ;;  %v1201_v54 = vrot.slane %v1176_v29, %v1200_v50 }
 0x3f1   :  { %v1209_v55 = vrot.slane %v1176_v29, %v1208_v51 }
 0x3f3   :  { %1627 = vmatpush1.bf16.msra.mxu1 %v1854_v59  ;;  %1668 = vmatpush1.bf16.msra.mxu0 %v1856_v60 }
 0x3f4   :  { %1628 = vmatprep.subr.bf16.mxu1 %v1863_v61  ;;  %1669 = vmatprep.subr.bf16.mxu0 %v1865_v62 }
 0x3f7   :  { %1629 = vmatpush1.bf16.msra.mxu1 %v1862_v3  ;;  %1670 = vmatpush1.bf16.msra.mxu0 %v1864_v4 }
 0x3f8   :  { %1630 = vmatprep.subr.bf16.mxu1 %v1871_v5  ;;  %1671 = vmatprep.subr.bf16.mxu0 %v1873_v6 }
 0x3fb   :  { %1631 = vmatpush1.bf16.msra.mxu1 %v1870_v11  ;;  %1672 = vmatpush1.bf16.msra.mxu0 %v1872_v12 }
 0x3fc   :  { %1632 = vmatprep.subr.bf16.mxu1 %v1879_v14  ;;  %1673 = vmatprep.subr.bf16.mxu0 %v1881_v15 }
 0x3ff   :  { %1633 = vmatpush1.bf16.msra.mxu1 %v1878_v20  ;;  %1674 = vmatpush1.bf16.msra.mxu0 %v1880_v21 }
 0x400   :  { %1634 = vmatprep.subr.bf16.mxu1 %v1887_v13  ;;  %1675 = vmatprep.subr.bf16.mxu0 %v1889_v22 }
 0x403   :  { %1635 = vmatpush1.bf16.msra.mxu1 %v1886_v23  ;;  %1676 = vmatpush1.bf16.msra.mxu0 %v1888_v24 }
 0x406   :  { %1653 = vmatmul.mubr.bf16.vlgmr.msra.gmra.mrb[16].mxu1 %v2402_v36  ;;  %1694 = vmatmul.mubr.bf16.vlgmr.msra.gmra.mrb[20].mxu0 %v2402_v36 }
 0x4b9   :  { %v1572_v37 = vpop.f32.mrb[12].mxu1  ;;  %v1613_v38 = vpop.f32.mrb[16].mxu0 }
 0x4ba   :  { %v1573_v39 = vadd.f32 %v1572_v37, %v1181_v32  ;;  %v1614_v40 = vadd.f32 %v1613_v38, %v1189_v33  ;;  %v1574_v41 = vpop.f32.mrb[13].mxu1  ;;  %v1615_v36 = vpop.f32.mrb[17].mxu0 }
 0x4bb   :  { %v1575_v42 = vadd.f32 %v1574_v41, %v1185_v34  ;;  %v1616_v43 = vadd.f32 %v1615_v36, %v1193_v35  ;;  %v1576_v44 = vpop.f32.mrb[14].mxu1  ;;  %v1617_v45 = vpop.f32.mrb[18].mxu0 }
 0x4bc   :  { %1702 = vst [vmem:[#allocation8] sm:$0xff] %v1573_v39  ;;  %1704 = vst [vmem:[#allocation8 + $0x10] sm:$0xff] %v1614_v40  ;;  %v1577_v46 = vpop.f32.mrb[15].mxu1  ;;  %v1618_v47 = vpop.f32.mrb[19].mxu0 }
 0x4bd   :  { %1703 = vst [vmem:[#allocation8 + $0x8] sm:$0xff] %v1575_v42  ;;  %1705 = vst [vmem:[#allocation8 + $0x18] sm:$0xff] %v1616_v43 }
 0x4d9   :  { %v1654_v56 = vpop.f32.mrb[16].mxu1  ;;  %v1695_v57 = vpop.f32.mrb[20].mxu0 }
 0x4da   :  { %v1655_v58 = vadd.f32 %v1654_v56, %v1197_v52  ;;  %v1696_v59 = vadd.f32 %v1695_v57, %v1205_v53  ;;  %v1656_v60 = vpop.f32.mrb[17].mxu1  ;;  %v1697_v61 = vpop.f32.mrb[21].mxu0 }
 0x4db   :  { %v1657_v62 = vadd.f32 %v1656_v60, %v1201_v54  ;;  %v1698_v63 = vadd.f32 %v1697_v61, %v1209_v55  ;;  %v1658_v0 = vpop.f32.mrb[18].mxu1  ;;  %v1699_v1 = vpop.f32.mrb[22].mxu0 }
 0x4dc   :  { %1706 = vst [vmem:[#allocation8 + $0x20] sm:$0xff] %v1655_v58  ;;  %1708 = vst [vmem:[#allocation8 + $0x30] sm:$0xff] %v1696_v59  ;;  %v1659_v2 = vpop.f32.mrb[19].mxu1  ;;  %v1700_v3 = vpop.f32.mrb[23].mxu0 }
 0x4dd   :  { %1707 = vst [vmem:[#allocation8 + $0x28] sm:$0xff] %v1657_v62  ;;  %1709 = vst [vmem:[#allocation8 + $0x38] sm:$0xff] %v1698_v63 }
 0x4de   :  { %2249 = shalt.err (!%p2246_p0)
}
 0x4df   :  { %s2250_s29 = scalar_lea.hbm %s2429_s6, 1024 }
 0x4e0   :  { %p2251_p1 = scmp.ne.s32.totalorder %s2429_s6, %s2250_s29  ;;  %p2254_p2 = scmp.lt.u32.totalorder %s2250_s29, %s2429_s6 }
 0x4e2   :  { %p2256_p3 = pnand %p2254_p2, %p2251_p1 }
 0x4e4   :  { %2259 = shalt.err (!%p2256_p3)
}
 0x4e5   :  { %1719 = dma.vmem_to_hbm [thread:$0]  %s1717_s25, 1024, %s2429_s6, [#allocation4]  }
 0x4e6   :  { %2264 = dma.done.wait [#allocation4], 1024  }
 0x4e7   :  { %2265 = vsyncadd [#allocation4], 4294966272 }
 0x4e8   :  { %1723 = vsyncpa [#allocation3], 1 }
 0x4e9   :  { %1724 = vsyncpa [#allocation6], 1 }
 0x4ea   :  { %1725 = vsyncpa [#allocation4], 1 }

</bundles_post_ra>
